<compile_context>
chip_gen: v7x
topology: tpu7x:2x2x1
jax: 0.10.0
libtpu: 0.0.40
codegen_flags: <defaults>
</compile_context>

<pallas_src>
import jax
import jax.numpy as jnp
from jax.experimental import pallas as pl
from jax.experimental.pallas import tpu as pltpu


def _attention_kernel(x_ref, wc_ref, b_ref, wq_ref, o_ref):
    # x_ref block: (bt, T, D); weights are full arrays resident in VMEM.
    bt, t, d = x_ref.shape
    a = wc_ref.shape[1]
    hp = jax.lax.Precision.HIGHEST

    x3 = x_ref[...]                                     # (bt, T, D) f32

    # hidden = tanh(x @ (Wa + Wv)^T + (ba + bv)); canonical 2-D MXU matmul on
    # the collapsed (bt*T, D) LHS (collapse is layout-free when T % 8 == 0).
    h = jnp.tanh(
        jnp.dot(
            x3.reshape(bt * t, d),
            wc_ref[...],
            preferred_element_type=jnp.float32,
            precision=hp,
        )
        + b_ref[...]                                    # (1, A) broadcasts over rows
    )                                                   # (bt*T, A)

    # scores as a lane-dense (bt, T) array -> dense softmax lane reductions.
    s = jnp.sum(h.reshape(bt, t, a) * wq_ref[...], axis=-1)   # (bt, T)
    s = s - jnp.max(s, axis=-1, keepdims=True)
    e = jnp.exp(s)
    w = e / jnp.sum(e, axis=-1, keepdims=True)          # exact softmax weights

    # weighted sum over time: batched (1, T) @ (T, D) MXU contraction.
    out = jnp.einsum(
        "bqt,btd->bqd",
        w[:, None, :],
        x3,
        preferred_element_type=jnp.float32,
        precision=hp,
    )                                                   # (bt, 1, D)
    o_ref[...] = out[:, 0, :].astype(o_ref.dtype)


def _choose_bt(B, T, D, itemsize):
    """Batches per grid step.

    Targets: (a) ~2 MiB x blocks (>= ~85% of the measured HBM roofline),
    (b) >= ~8 grid steps so each v7x TensorCore gets >= 4 pipelined
    iterations, (c) bt a multiple of 8 (sublane-aligned output stores) or
    bt == B (full-array block, exempt from the (8,128) rule).
    """
    per_batch = max(1, T * D * itemsize)
    bt_bytes = max(1, (2 << 20) // per_batch)   # ~2 MiB x-block target
    bt_steps = max(1, B // 8)                   # >= ~8 grid steps when B allows
    bt = min(bt_bytes, bt_steps, B)
    if bt >= B:
        return B
    bt = max(8, (bt // 8) * 8)
    return B if bt >= B else bt


def advanced_attention(x, wa, ba, wv, bv, wq):
    """x: (B, T, D).  wa, wv: (A, D) PyTorch Linear weights; ba, bv: (A,); wq: (1, A)."""
    B, T, D = x.shape
    A = wa.shape[0]
    dt = x.dtype

    # Merge the two input projections (exact algebra in f32).
    wc = (wa + wv).T.astype(dt)                         # (D, A)
    bias = (ba + bv).reshape(1, A).astype(dt)           # (1, A)
    wq2 = wq.reshape(1, A).astype(dt)                   # (1, A)

    bt = _choose_bt(B, T, D, dt.itemsize)
    grid = (pl.cdiv(B, bt),)

    cost = pl.CostEstimate(
        flops=2 * B * T * A * (D + 1) + 2 * B * T * D,
        transcendentals=B * T * (A + 1),                # tanh + exp
        bytes_accessed=(B * T * D + D * A + 2 * A + B * D) * dt.itemsize,
    )

    out = pl.pallas_call(
        _attention_kernel,
        out_shape=jax.ShapeDtypeStruct((B, D), dt),
        grid_spec=pltpu.PrefetchScalarGridSpec(
            num_scalar_prefetch=0,
            grid=grid,
            in_specs=[
                pl.BlockSpec((bt, T, D), lambda i: (i, 0, 0)),   # per-step x tile
                pl.BlockSpec((D, A), lambda i: (0, 0)),          # merged weight (grid-invariant)
                pl.BlockSpec((1, A), lambda i: (0, 0)),          # merged bias
                pl.BlockSpec((1, A), lambda i: (0, 0)),          # query weight
            ],
            out_specs=pl.BlockSpec((bt, D), lambda i: (i, 0)),
        ),
        compiler_params=pltpu.CompilerParams(
            dimension_semantics=("parallel",),
            vmem_limit_bytes=32 << 20,
        ),
        cost_estimate=cost,
    )(x, wc, bias, wq2)

    return out


def advanced_attention_ref(x, wa, ba, wv, bv, wq):
    # Pure-JAX reference mirroring the PyTorch forward (f32-accurate matmuls).
    hp = jax.lax.Precision.HIGHEST
    att = jnp.dot(x, wa.T, precision=hp) + ba
    val = jnp.dot(x, wv.T, precision=hp) + bv
    scores = jnp.dot(jnp.tanh(att + val), wq.T, precision=hp)   # (B, T, 1)
    weights = jax.nn.softmax(scores, axis=1)
    return jnp.sum(x * weights, axis=1)


if __name__ == "__main__":
    B, T, D, A = 2, 8, 32, 16  # batch, seq, input_dim, attention_dim

    key = jax.random.PRNGKey(0)
    kx, kwa, kba, kwv, kbv, kwq = jax.random.split(key, 6)

    x = jax.random.normal(kx, (B, T, D), dtype=jnp.float32)
    # Deterministic synthetic parameters (PyTorch Linear layout: (out, in)).
    wa = jax.random.normal(kwa, (A, D), dtype=jnp.float32) * 0.1
    ba = jax.random.normal(kba, (A,), dtype=jnp.float32) * 0.1
    wv = jax.random.normal(kwv, (A, D), dtype=jnp.float32) * 0.1
    bv = jax.random.normal(kbv, (A,), dtype=jnp.float32) * 0.1
    wq = jax.random.normal(kwq, (1, A), dtype=jnp.float32) * 0.1

    out = jax.block_until_ready(advanced_attention(x, wa, ba, wv, bv, wq))
    ref = advanced_attention_ref(x, wa, ba, wv, bv, wq)

    assert out.shape == (B, D)
    # Exact softmax + HIGHEST-precision matmuls: observed error is ~1e-6; the
    # tolerance below is conservative headroom for MXU f32 emulation modes.
    err = jnp.max(jnp.abs(out - ref))
    assert jnp.allclose(out, ref, atol=1e-3, rtol=1e-3), f"mismatch vs reference (max abs err {err})"

    print("KERNEL_OK")
</pallas_src>

<mosaic_0001>
module attributes {stable_mosaic.version = 11 : i64} {
  func.func @_attention_kernel(%arg0: i32, %arg1: memref<2x8x32xf32, #tpu.memory_space<vmem>>, %arg2: memref<32x16xf32, #tpu.memory_space<vmem>>, %arg3: memref<1x16xf32, #tpu.memory_space<vmem>>, %arg4: memref<1x16xf32, #tpu.memory_space<vmem>>, %arg5: memref<2x32xf32, #tpu.memory_space<vmem>>) attributes {dimension_semantics = [#tpu.dimension_semantics<parallel>], iteration_bounds = array<i64: 1>, scalar_prefetch = 0 : i64, scratch_operands = 0 : i64, tpu.core_type = #tpu.core_type<tc>, window_params = [{transform_indices = @transform_0, window_bounds = array<i64: 2, 8, 32>}, {pipeline_mode = #tpu.pipeline_mode<synchronous>, transform_indices = @transform_1, window_bounds = array<i64: 32, 16>}, {pipeline_mode = #tpu.pipeline_mode<synchronous>, transform_indices = @transform_2, window_bounds = array<i64: 1, 16>}, {pipeline_mode = #tpu.pipeline_mode<synchronous>, transform_indices = @transform_3, window_bounds = array<i64: 1, 16>}, {transform_indices = @transform_4, window_bounds = array<i64: 2, 32>}]} {
    %c0 = arith.constant 0 : index
    %c0_0 = arith.constant 0 : index
    %c0_1 = arith.constant 0 : index
    %0 = vector.load %arg1[%c0, %c0_0, %c0_1] : memref<2x8x32xf32, #tpu.memory_space<vmem>>, vector<2x8x32xf32>
    %1 = vector.shape_cast %0 : vector<2x8x32xf32> to vector<16x32xf32>
    %c0_2 = arith.constant 0 : index
    %c0_3 = arith.constant 0 : index
    %2 = vector.load %arg2[%c0_2, %c0_3] : memref<32x16xf32, #tpu.memory_space<vmem>>, vector<32x16xf32>
    %cst = arith.constant dense<0.000000e+00> : vector<16x16xf32>
    %3 = tpu.matmul %1, %2, %cst {dimension_numbers = #tpu.dot_dimension_numbers<[1], [0], [0], [1], [0, 0, 1, 1], [], []>, precision = #tpu.contract_precision<fp32>} : vector<16x32xf32>, vector<32x16xf32>, vector<16x16xf32> -> vector<16x16xf32>
    %c0_4 = arith.constant 0 : index
    %c0_5 = arith.constant 0 : index
    %4 = vector.load %arg3[%c0_4, %c0_5] : memref<1x16xf32, #tpu.memory_space<vmem>>, vector<1x16xf32>
    %5 = vector.broadcast %4 : vector<1x16xf32> to vector<16x16xf32>
    %6 = arith.addf %3, %5 : vector<16x16xf32>
    %7 = math.tanh %6 : vector<16x16xf32>
    %8 = vector.shape_cast %7 : vector<16x16xf32> to vector<2x8x16xf32>
    %c0_6 = arith.constant 0 : index
    %c0_7 = arith.constant 0 : index
    %9 = vector.load %arg4[%c0_6, %c0_7] : memref<1x16xf32, #tpu.memory_space<vmem>>, vector<1x16xf32>
    %10 = vector.shape_cast %9 : vector<1x16xf32> to vector<1x1x16xf32>
    %11 = vector.broadcast %10 : vector<1x1x16xf32> to vector<2x8x16xf32>
    %12 = arith.mulf %8, %11 : vector<2x8x16xf32>
    %cst_8 = arith.constant dense<0.000000e+00> : vector<2x8xf32>
    %13 = vector.multi_reduction <add>, %12, %cst_8 [2] : vector<2x8x16xf32> to vector<2x8xf32>
    %cst_9 = arith.constant dense<0xFF800000> : vector<2xf32>
    %14 = vector.multi_reduction <maximumf>, %13, %cst_9 [1] : vector<2x8xf32> to vector<2xf32>
    %15 = vector.shape_cast %14 : vector<2xf32> to vector<2x1xf32>
    %16 = vector.broadcast %15 : vector<2x1xf32> to vector<2x8xf32>
    %17 = arith.subf %13, %16 : vector<2x8xf32>
    %18 = math.exp %17 : vector<2x8xf32>
    %cst_10 = arith.constant dense<0.000000e+00> : vector<2xf32>
    %19 = vector.multi_reduction <add>, %18, %cst_10 [1] : vector<2x8xf32> to vector<2xf32>
    %20 = vector.shape_cast %19 : vector<2xf32> to vector<2x1xf32>
    %21 = vector.broadcast %20 : vector<2x1xf32> to vector<2x8xf32>
    %22 = arith.divf %18, %21 : vector<2x8xf32>
    %23 = vector.shape_cast %22 : vector<2x8xf32> to vector<2x1x8xf32>
    "tpu.trace_start"() <{level = 10 : i32, message = "bqt,btd->bqd"}> : () -> ()
    %cst_11 = arith.constant dense<0.000000e+00> : vector<2x1x32xf32>
    %24 = tpu.matmul %23, %0, %cst_11 {dimension_numbers = #tpu.dot_dimension_numbers<[2], [1], [1], [2], [0, 0, 0, 1, 1, 2], [0], [0]>, precision = #tpu.contract_precision<fp32>} : vector<2x1x8xf32>, vector<2x8x32xf32>, vector<2x1x32xf32> -> vector<2x1x32xf32>
    "tpu.trace_stop"() : () -> ()
    %25 = vector.shape_cast %24 : vector<2x1x32xf32> to vector<2x32xf32>
    %c0_12 = arith.constant 0 : index
    %c0_13 = arith.constant 0 : index
    %26 = vector.load %arg5[%c0_12, %c0_13] : memref<2x32xf32, #tpu.memory_space<vmem>>, vector<2x32xf32>
    tpu.vector_store %arg5[%c0_12, %c0_13], %25 {strides = array<i32>} : memref<2x32xf32, #tpu.memory_space<vmem>>, vector<2x32xf32>,
    return
  }
  func.func @transform_0(%arg0: i32) -> (i32, i32, i32) {
    %c0_i32 = arith.constant 0 : i32
    %c0_i32_0 = arith.constant 0 : i32
    %c0_i32_1 = arith.constant 0 : i32
    return %arg0, %c0_i32, %c0_i32_0 : i32, i32, i32
  }
  func.func @transform_1(%arg0: i32) -> (i32, i32) {
    %c0_i32 = arith.constant 0 : i32
    %c0_i32_0 = arith.constant 0 : i32
    %c0_i32_1 = arith.constant 0 : i32
    return %c0_i32, %c0_i32_0 : i32, i32
  }
  func.func @transform_2(%arg0: i32) -> (i32, i32) {
    %c0_i32 = arith.constant 0 : i32
    %c0_i32_0 = arith.constant 0 : i32
    %c0_i32_1 = arith.constant 0 : i32
    return %c0_i32, %c0_i32_0 : i32, i32
  }
  func.func @transform_3(%arg0: i32) -> (i32, i32) {
    %c0_i32 = arith.constant 0 : i32
    %c0_i32_0 = arith.constant 0 : i32
    %c0_i32_1 = arith.constant 0 : i32
    return %c0_i32, %c0_i32_0 : i32, i32
  }
  func.func @transform_4(%arg0: i32) -> (i32, i32) {
    %c0_i32 = arith.constant 0 : i32
    %c0_i32_0 = arith.constant 0 : i32
    return %arg0, %c0_i32 : i32, i32
  }
}

</mosaic_0001>

<bundles_post_ra>
// kernel: tpu_custom_call.1
= control target key start
LH: loop header
LB: loop body
LE: loop exit
PB: predicated region body
PF: predicated region fallthrough
CT: control target
= control target key end

     0   :  { %vm31_vm0 = vcmask 261120   ;;  %s2054_s0 = inlined_call_operand.vmem [shape: f32[2,8,32], index: 0, kind: input, shape index: {}]   ;;  %s2055_s1 = inlined_call_operand.vmem [shape: f32[32,16], index: 1, kind: input, shape index: {}]   ;;  %s2056_s2 = inlined_call_operand.vmem [shape: f32[1,16], index: 2, kind: input, shape index: {}]   ;;  %s2057_s3 = inlined_call_operand.vmem [shape: f32[1,16], index: 3, kind: input, shape index: {}]   ;;  %s2058_s4 = inlined_call_operand.hbm [shape: f32[2,32], index: 4, kind: output, shape index: {}]  }
   0x1   :  { %v20_v0 = vld [vmem:[%s2055_s1] sm:$0xff]  ;;  %v21_v1 = vld [vmem:[%s2055_s1 + $0x8] sm:$0xff]  ;;  %v22_v2 = vld [vmem:[%s2055_s1 + $0x10] sm:$0xff] }
   0x2   :  { %v39_v3 = vand.u32 4294901760, %v20_v0  ;;  %v42_v4 = vand.u32 4294901760, %v21_v1  ;;  %v23_v5 = vld [vmem:[%s2055_s1 + $0x18] sm:$0xff]  ;;  %v45_v6 = vand.u32 4294901760, %v22_v2  ;;  %v1944_v7 = vld [vmem:[%s2054_s0] sm:$0xff]  ;;  %v1949_v8 = vld [vmem:[%s2054_s0 + $0x8] sm:$0xff] }
   0x3   :  { %v48_v9 = vand.u32 4294901760, %v23_v5  ;;  %v33_v10 = vsel %vm31_vm0, %v1944_v7, 0  ;;  %v36_v11 = vsel %vm31_vm0, %v1949_v8, 0 }
   0x4   :  { %v1953_v12 = vpack.c.bf16 %v42_v4, %v39_v3  ;;  %v1955_v13 = vand.u32 4294901760, %v33_v10  ;;  %v1957_v14 = vand.u32 4294901760, %v36_v11  ;;  %v129_v15 = vsub.f32 %v20_v0, %v39_v3 }
   0x5   :  { %9 = vsyncpa [#allocation3], 0  ;;  %v1959_v16 = vpack.c.bf16 %v48_v9, %v45_v6  ;;  %v136_v17 = vsub.f32 %v21_v1, %v42_v4  ;;  %v143_v18 = vsub.f32 %v22_v2, %v45_v6  ;;  %v150_v19 = vsub.f32 %v23_v5, %v48_v9  ;;  %v1590_v46 = vld [vmem:[%s2056_s2] ss:$0 sm:$0xff]  ;;  %s1903_s2 = smov [#allocation2]  }
   0x6   :  { %1779 = vmatprep.subr.bf16.mxu0 %v1953_v12  ;;  %v108_v20 = vsub.f32 %v33_v10, %v1955_v13  ;;  %v118_v21 = vsub.f32 %v36_v11, %v1957_v14  ;;  %v130_v22 = vand.u32 4294901760, %v129_v15  ;;  %v1591_v51 = vld [vmem:[%s2057_s3] ss:$0 sm:$0xff]  ;;  %vm577_vm1 = vcmask 130048   ;;  %s1582_s3 = sshll.u32 %s1903_s2, 4  ;;  %s1583_s3 = int_to_ptr.vmem [resolvable:$true] %s1582_s3 }
   0x7   :  { %1781 = vmatpush3.bf16.msra.mxu0 %v1953_v12  ;;  %v137_v23 = vand.u32 4294901760, %v136_v17  ;;  %v144_v24 = vand.u32 4294901760, %v143_v18  ;;  %v151_v25 = vand.u32 4294901760, %v150_v19  ;;  %v1794_v42 = vpack.c.bf16 %v136_v17, %v129_v15  ;;  %s1876_s29 = scalar_lea.vmem %s1583_s3, 32  ;;  %p1881_p1 = scmp.lt.s32.totalorder %s1583_s3, %s1583_s3 }
   0x8   :  { %1783 = vmatprep.subr.bf16.mxu0 %v1959_v16  ;;  %v109_v26 = vand.u32 4294901760, %v108_v20  ;;  %v119_v27 = vand.u32 4294901760, %v118_v21  ;;  %v131_v28 = vsub.f32 %v129_v15, %v130_v22  ;;  %v1798_v43 = vpack.c.bf16 %v150_v19, %v143_v18  ;;  %p1877_p0 = scmp.ne.s32.totalorder %s1583_s3, %s1876_s29  ;;  %p1882_p2 = scmp.lt.s32.totalorder %s1876_s29, %s1876_s29 }
   0x9   :  { %v138_v29 = vsub.f32 %v136_v17, %v137_v23  ;;  %v145_v30 = vsub.f32 %v143_v18, %v144_v24  ;;  %v152_v31 = vsub.f32 %v150_v19, %v151_v25  ;;  %v1810_v44 = vpack.c.bf16 %v137_v23, %v130_v22 }
   0xa   :  { %v110_v32 = vsub.f32 %v108_v20, %v109_v26  ;;  %v120_v33 = vsub.f32 %v118_v21, %v119_v27  ;;  %v132_v34 = vand.u32 4294901760, %v131_v28  ;;  %v1814_v45 = vpack.c.bf16 %v151_v25, %v144_v24  ;;  %p1883_p3 = por %p1882_p2, %p1881_p1 }
   0xb   :  { %1785 = vmatpush3.bf16.msra.mxu0 %v1959_v16  ;;  %v139_v35 = vand.u32 4294901760, %v138_v29  ;;  %v146_v36 = vand.u32 4294901760, %v145_v30  ;;  %v153_v37 = vand.u32 4294901760, %v152_v31  ;;  %v586_v58 = vlaneseq }
   0xc   :  { %v111_v38 = vand.u32 4294901760, %v110_v32  ;;  %v121_v39 = vand.u32 4294901760, %v120_v33  ;;  %vm596_vm2 = vcmask 1041409   ;;  %vm599_vm3 = vcmask 58368   ;;  %p1884_p4 = pnand %p1883_p3, %p1877_p0 }
   0xd   :  { %v1786_v40 = vpack.c.bf16 %v139_v35, %v132_v34  ;;  %v1790_v41 = vpack.c.bf16 %v153_v37, %v146_v36  ;;  %v587_v59 = vand.u32 127, %v586_v58  ;;  %v589_v60 = vshrl.u32 %v586_v58, 7 }
   0xe   :  { %1660 = vmatprep.mubr.f32.mxu0 %v111_v38  ;;  %v1900_v4 = vmov 0   ;;  %v668_v31 = vand.u32 4294901760, %v1944_v7  ;;  %v1901_v32 = vmov 0.0   ;;  %vm1902_vm4 = vmmov 0  }
   0xf   :  { %1661 = vmatmul.mubr.f32.vlgmr.msra.gmra.mrb[0].mxu0 %v121_v39  ;;  %1787 = vmatprep.subr.bf16.mxu0 %v1786_v40  ;;  %v1987_v62 = vsub.s32 %v587_v59, %v589_v60  ;;  %v606_v5 = vsub.s32 0, %v589_v60  ;;  %v610_v6 = vsub.s32 1, %v589_v60  ;;  %vm664_vm5 = vcmask 64512  }
  0x10   :  { %1789 = vmatpush3.bf16.msra.mxu0 %v1786_v40  ;;  %1671 = vmatprep.mubr.f32.mxu0 %v1955_v13  ;;  %v745_v33 = vsub.f32 %v1944_v7, %v668_v31  ;;  %vm1574_vm6 = vcmask 254976  }
  0x11   :  { %1791 = vmatprep.subr.bf16.mxu0 %v1790_v41  ;;  %1863 = vset.pattern.permute.xlu0 %v1900_v4 }
  0x12   :  { %1862 = vset.pattern.permute.xlu1 %v1900_v4  ;;  %1718 = vmatprep.subr.mxu1 %v1901_v32  ;;  %v746_v37 = vand.u32 4294901760, %v745_v33 }
  0x13   :  { %1720 = vmatprep.mubr.msk.f32.mxu1 %vm1902_vm4, %v1901_v32  ;;  %1719 = vmatpush3.msra.mxu1 %v668_v31 }
  0x14   :  { %1793 = vmatpush3.bf16.msra.mxu0 %v1790_v41  ;;  %1723 = vmatprep.subr.mxu1 %v1901_v32  ;;  %v747_v40 = vsub.f32 %v745_v33, %v746_v37 }
  0x15   :  { %1795 = vmatprep.subr.bf16.mxu0 %v1794_v42 }
  0x17   :  { %1672 = vmatmul.mubr.f32.vlgmr.msra.gmra.mrb[0].mxu0 %v1957_v14 }
  0x18   :  { %1797 = vmatpush3.bf16.msra.mxu0 %v1794_v42  ;;  %1682 = vmatprep.mubr.f32.mxu0 %v108_v20 }
  0x19   :  { %1799 = vmatprep.subr.bf16.mxu0 %v1798_v43 }
  0x1c   :  { %1801 = vmatpush3.bf16.msra.mxu0 %v1798_v43  ;;  %v748_v43 = vand.u32 4294901760, %v747_v40 }
  0x1d   :  { %1803 = vmatprep.subr.bf16.mxu0 %v1953_v12 }
  0x1f   :  { %1683 = vmatmul.mubr.f32.vlgmr.msra.gmra.mrb[0].mxu0 %v118_v21 }
  0x20   :  { %1805 = vmatpush3.bf16.msra.mxu0 %v1953_v12  ;;  %1693 = vmatprep.mubr.f32.mxu0 %v109_v26 }
  0x21   :  { %1807 = vmatprep.subr.bf16.mxu0 %v1959_v16 }
  0x24   :  { %1809 = vmatpush3.bf16.msra.mxu0 %v1959_v16 }
  0x25   :  { %1811 = vmatprep.subr.bf16.mxu0 %v1810_v44 }
  0x27   :  { %1694 = vmatmul.mubr.f32.vlgmr.msra.gmra.mrb[0].mxu0 %v119_v27 }
  0x28   :  { %1813 = vmatpush3.bf16.msra.mxu0 %v1810_v44  ;;  %1704 = vmatprep.mubr.f32.mxu0 %v1955_v13 }
  0x29   :  { %1815 = vmatprep.subr.bf16.mxu0 %v1814_v45 }
  0x2c   :  { %1817 = vmatpush3.bf16.msra.mxu0 %v1814_v45 }
  0x2d   :  { %1819 = vmatprep.subr.bf16.mxu0 %v1953_v12 }
  0x2f   :  { %1705 = vmatmul.mubr.f32.vlgmr.msra.gmra.mrb[0].mxu0 %v1957_v14 }
  0x30   :  { %1821 = vmatpush3.bf16.msra.mxu0 %v1953_v12  ;;  %1715 = vmatprep.mubr.f32.mxu0 %v1955_v13 }
  0x31   :  { %1823 = vmatprep.subr.bf16.mxu0 %v1959_v16 }
  0x34   :  { %1825 = vmatpush3.bf16.msra.mxu0 %v1959_v16 }
  0x37   :  { %1716 = vmatmul.mubr.f32.vlgmr.msra.gmra.mrb[0].mxu0 %v1957_v14 }
 0x10a   :  { %v1717_v47 = vpop.f32.mrb[0].mxu0 }
 0x10b   :  { %v1826_v48 = vadd.f32 %v1717_v47, %v1590_v46  ;;  %v556_v49 = vpop.f32.mrb[1].mxu0  ;;  %v1124_v47 = vand.u32 4294901760, %v1949_v8 }
 0x10c   :  { %v1827_v50 = vadd.f32 %v1590_v46, %v556_v49 }
 0x10d   :  { %1864 = vtanh.f32 %v1826_v48  ;;  %v1201_v49 = vsub.f32 %v1949_v8, %v1124_v47 }
 0x10e   :  { %1866 = vtanh.f32 %v1827_v50 }
 0x117   :  { %v1865_v52 = vpop.eup %1864 }
 0x118   :  { %v1867_v53 = vpop.eup %1866  ;;  %v576_v56 = vmul.f32 %v1865_v52, %v1591_v51 }
 0x119   :  { %v575_v54 = vmul.f32 %v1867_v53, %v1591_v51  ;;  %v1202_v51 = vand.u32 4294901760, %v1201_v49 }
 0x11a   :  { %v581_v57 = vsel %vm577_vm1, %v576_v56, 0.0 }
 0x11b   :  { %v578_v55 = vsel %vm577_vm1, %v575_v54, 0.0  ;;  %v1203_v53 = vsub.f32 %v1201_v49, %v1202_v51 }
 0x11c   :  { %579 = vadd.xlane.f32.xlu0 %v578_v55 }
 0x11d   :  { %v1204_v55 = vand.u32 4294901760, %v1203_v53 }
 0x120   :  { %582 = vadd.xlane.f32.xlu0 %v581_v57 }
 0x1a9   :  { %v580_v61 = vpop.xlane.xlu0 %579 }
 0x1aa   :  { %v591_v0 = vrot.slane %v580_v61, %v1987_v62 }
 0x1ad   :  { %v583_v63 = vpop.xlane.xlu0 %582 }
 0x1ae   :  { %v595_v1 = vrot.slane %v583_v63, %v1987_v62 }
 0x1b0   :  { %v597_v2 = vsel %vm596_vm2, %v595_v1, %v591_v0 }
 0x1b1   :  { %v600_v3 = vsel %vm599_vm3, %v597_v2, -inf }
 0x1b2   :  { %601 = vmax.xlane.f32.xlu1 %v600_v3 }
 0x23f   :  { %v602_v9 = vpop.xlane.xlu1 %601 }
 0x240   :  { %v607_v10 = vrot.slane %v602_v9, %v606_v5  ;;  %v611_v11 = vrot.slane %v602_v9, %v610_v6 }
 0x242   :  { %v614_v12 = vsub.f32 %v580_v61, %v607_v10  ;;  %v615_v13 = vsub.f32 %v583_v63, %v611_v11 }
 0x244   :  { %v616_v14 = vmul.f32 1.442695, %v614_v12  ;;  %v618_v15 = vmul.f32 1.442695, %v615_v13 }
 0x246   :  { %1868 = vpow2.f32 %v616_v14 }
 0x247   :  { %1870 = vpow2.f32 %v618_v15 }
 0x250   :  { %v1869_v16 = vpop.eup %1868 }
 0x251   :  { %v1871_v17 = vpop.eup %1870  ;;  %623 = vperm.xlu1 %1862, %v1869_v16  }
 0x252   :  { %626 = vperm.xlu0 %1863, %v1871_v17  }
 0x2d0   :  { %v624_v18 = vpop.permute.xlu1 %623 }
 0x2d1   :  { %v627_v19 = vpop.permute.xlu0 %626  ;;  %v631_v20 = vrot.slane %v624_v18, %v1987_v62 }
 0x2d2   :  { %v635_v21 = vrot.slane %v627_v19, %v1987_v62 }
 0x2d4   :  { %v636_v22 = vsel %vm596_vm2, %v635_v21, %v631_v20 }
 0x2d5   :  { %v638_v23 = vsel %vm599_vm3, %v636_v22, 0.0 }
 0x2d6   :  { %639 = vadd.xlane.f32.xlu1 %v638_v23 }
 0x363   :  { %v640_v24 = vpop.xlane.xlu1 %639 }
 0x364   :  { %v645_v25 = vrot.slane %v640_v24, %v606_v5  ;;  %v649_v26 = vrot.slane %v640_v24, %v610_v6 }
 0x366   :  { %1872 = vrcp.f32 %v645_v25 }
 0x367   :  { %1874 = vrcp.f32 %v649_v26 }
 0x370   :  { %v1873_v27 = vpop.eup %1872 }
 0x371   :  { %v653_v28 = vmul.f32 %v1873_v27, %v1869_v16  ;;  %v1875_v29 = vpop.eup %1874 }
 0x372   :  { %v655_v30 = vmul.f32 %v1875_v29, %v1871_v17 }
 0x373   :  { %658 = vperm.xlu0 %1863, %v653_v28  }
 0x377   :  { %1115 = vperm.xlu0 %1863, %v655_v30  }
 0x3f2   :  { %v659_v34 = vpop.permute.xlu0 %658 }
 0x3f3   :  { %v663_v35 = vrot.slane %v659_v34, %v1987_v62 }
 0x3f5   :  { %v665_v36 = vsel %vm664_vm5, %v663_v35, 0 }
 0x3f6   :  { %v733_v38 = vand.u32 4294901760, %v665_v36  ;;  %v1116_v7 = vpop.permute.xlu0 %1115 }
 0x3f7   :  { %v1120_v45 = vrot.slane %v1116_v7, %v1987_v62 }
 0x3f8   :  { %v734_v39 = vsub.f32 %v665_v36, %v733_v38 }
 0x3f9   :  { %v1121_v46 = vsel %vm664_vm5, %v1120_v45, 0 }
 0x3fa   :  { %v735_v41 = vand.u32 4294901760, %v734_v39  ;;  %v1189_v48 = vand.u32 4294901760, %v1121_v46 }
 0x3fc   :  { %v736_v42 = vsub.f32 %v734_v39, %v735_v41  ;;  %v1190_v50 = vsub.f32 %v1121_v46, %v1189_v48 }
 0x3fe   :  { %v737_v44 = vand.u32 4294901760, %v736_v42  ;;  %v1191_v52 = vand.u32 4294901760, %v1190_v50 }
 0x400   :  { %1721 = vmatmul.mubr.f32.vlgmr.msra.gmra.mrb[0].mxu1 %v737_v44  ;;  %v1192_v54 = vsub.f32 %v1190_v50, %v1191_v52 }
 0x401   :  { %1724 = vmatpush3.msra.mxu1 %v748_v43  ;;  %1725 = vmatprep.mubr.msk.f32.mxu1 %vm1902_vm4, %v1901_v32 }
 0x402   :  { %1728 = vmatprep.subr.mxu1 %v1901_v32  ;;  %v1193_v56 = vand.u32 4294901760, %v1192_v54 }
 0x408   :  { %1726 = vmatmul.mubr.f32.vlgmr.msra.gmra.mrb[0].mxu1 %v733_v38 }
 0x409   :  { %1729 = vmatpush3.msra.mxu1 %v745_v33  ;;  %1730 = vmatprep.mubr.msk.f32.mxu1 %vm1902_vm4, %v1901_v32 }
 0x40a   :  { %1733 = vmatprep.subr.mxu1 %v1901_v32 }
 0x410   :  { %1731 = vmatmul.mubr.f32.vlgmr.msra.gmra.mrb[0].mxu1 %v734_v39 }
 0x411   :  { %1734 = vmatpush3.msra.mxu1 %v668_v31  ;;  %1735 = vmatprep.mubr.msk.f32.mxu1 %vm1902_vm4, %v1901_v32 }
 0x412   :  { %1738 = vmatprep.subr.mxu1 %v1901_v32 }
 0x418   :  { %1736 = vmatmul.mubr.f32.vlgmr.msra.gmra.mrb[0].mxu1 %v735_v41 }
 0x419   :  { %1739 = vmatpush3.msra.mxu1 %v746_v37  ;;  %1740 = vmatprep.mubr.msk.f32.mxu1 %vm1902_vm4, %v1901_v32 }
 0x41a   :  { %1743 = vmatprep.subr.mxu1 %v1901_v32 }
 0x420   :  { %1741 = vmatmul.mubr.f32.vlgmr.msra.gmra.mrb[0].mxu1 %v733_v38 }
 0x421   :  { %1744 = vmatpush3.msra.mxu1 %v668_v31  ;;  %1745 = vmatprep.mubr.msk.f32.mxu1 %vm1902_vm4, %v1901_v32 }
 0x422   :  { %1748 = vmatprep.subr.mxu1 %v1901_v32 }
 0x428   :  { %1746 = vmatmul.mubr.f32.vlgmr.msra.gmra.mrb[0].mxu1 %v733_v38 }
 0x429   :  { %1749 = vmatpush3.msra.mxu1 %v1124_v47  ;;  %1750 = vmatprep.mubr.msk.f32.mxu1 %vm1902_vm4, %v1901_v32 }
 0x42a   :  { %1753 = vmatprep.subr.mxu1 %v1901_v32 }
 0x42c   :  { %1751 = vmatmul.mubr.f32.vlgmr.msra.gmra.mrb[2].mxu1 %v1193_v56 }
 0x42d   :  { %1754 = vmatpush3.msra.mxu1 %v1204_v55  ;;  %1755 = vmatprep.mubr.msk.f32.mxu1 %vm1902_vm4, %v1901_v32 }
 0x42e   :  { %1758 = vmatprep.subr.mxu1 %v1901_v32 }
 0x434   :  { %1756 = vmatmul.mubr.f32.vlgmr.msra.gmra.mrb[2].mxu1 %v1189_v48 }
 0x435   :  { %1759 = vmatpush3.msra.mxu1 %v1201_v49  ;;  %1760 = vmatprep.mubr.msk.f32.mxu1 %vm1902_vm4, %v1901_v32 }
 0x436   :  { %1763 = vmatprep.subr.mxu1 %v1901_v32 }
 0x43c   :  { %1761 = vmatmul.mubr.f32.vlgmr.msra.gmra.mrb[2].mxu1 %v1190_v50 }
 0x43d   :  { %1764 = vmatpush3.msra.mxu1 %v1124_v47  ;;  %1765 = vmatprep.mubr.msk.f32.mxu1 %vm1902_vm4, %v1901_v32 }
 0x43e   :  { %1768 = vmatprep.subr.mxu1 %v1901_v32 }
 0x444   :  { %1766 = vmatmul.mubr.f32.vlgmr.msra.gmra.mrb[2].mxu1 %v1191_v52 }
 0x445   :  { %1769 = vmatpush3.msra.mxu1 %v1202_v51  ;;  %1770 = vmatprep.mubr.msk.f32.mxu1 %vm1902_vm4, %v1901_v32 }
 0x446   :  { %1773 = vmatprep.subr.mxu1 %v1901_v32 }
 0x44c   :  { %1771 = vmatmul.mubr.f32.vlgmr.msra.gmra.mrb[2].mxu1 %v1189_v48 }
 0x44d   :  { %1774 = vmatpush3.msra.mxu1 %v1124_v47  ;;  %1775 = vmatprep.mubr.msk.f32.mxu1 %vm1902_vm4, %v1901_v32 }
 0x454   :  { %1776 = vmatmul.mubr.f32.vlgmr.msra.gmra.mrb[2].mxu1 %v1189_v48 }
 0x4fb   :  { %v1109_v8 = vpop.f32.mrb[0].mxu1 }
 0x4fc   :  { %v1747_v57 = vpop.f32.mrb[1].mxu1 }
 0x527   :  { %v1565_v58 = vpop.f32.mrb[2].mxu1 }
 0x528   :  { %v1571_v59 = vrot.slane %v1565_v58, 7  ;;  %v1777_v60 = vpop.f32.mrb[3].mxu1 }
 0x52a   :  { %v1572_v61 = vsel %vm596_vm2, %v1571_v59, %v1109_v8 }
 0x52b   :  { %1575 = vst.msk [vmem:[#allocation2] sm:$0x3] %vm1574_vm6, %v1572_v61 }
 0x52c   :  { %1887 = shalt.err (!%p1884_p4)
}
 0x52d   :  { %s1888_s6 = scalar_lea.hbm %s2058_s4, 32 }
 0x52e   :  { %p1889_p5 = scmp.ne.s32.totalorder %s2058_s4, %s1888_s6  ;;  %p1892_p6 = scmp.lt.u32.totalorder %s1888_s6, %s2058_s4 }
 0x530   :  { %p1894_p7 = pnand %p1892_p6, %p1889_p5 }
 0x532   :  { %1897 = shalt.err (!%p1894_p7)
}
 0x533   :  { %1585 = dma.vmem_to_hbm [thread:$0]  %s1583_s3, 32, %s2058_s4, [#allocation3]  }
 0x534   :  { %1898 = dma.done.wait [#allocation3], 32  }
 0x535   :  { %1899 = vsyncadd [#allocation3], 4294967264 }
 0x536   :  { %1589 = vsyncpa [#allocation3], 1 }

</bundles_post_ra>
